<compile_context>
chip_gen: v6e
topology: v6e:2x2x1
jax: 0.10.0
libtpu: 0.0.40
codegen_flags: <defaults>
</compile_context>

<pallas_src>
from typing import Literal
import functools

import jax
import jax.numpy as jnp
from jax.experimental import pallas as pl
from jax.experimental.pallas import tpu as pltpu

_MAX_DMA_CHUNKS = 4                        # max outstanding HBM->HBM DMAs per clone
_MIN_BYTES_FOR_CHUNKING = 2 * 1024 * 1024  # below this, one DMA is cheapest


@functools.lru_cache(maxsize=None)
def _build_dma_clone(orig_shape, view_shape, dtype_name, chunks):
    """Build (and cache) a jitted direct HBM->HBM DMA copy for one shape/dtype.

    `chunks` is a static tuple of (row_start, row_count) pairs along the
    leading axis of `view_shape`; each chunk gets its own DMA + semaphore so
    multiple transfers are outstanding at once.
    """
    dtype = jnp.dtype(dtype_name)
    n_chunks = len(chunks)
    n_rows = view_shape[0]

    def kernel(x_ref, o_ref, sems):
        copies = []
        for i, (start, size) in enumerate(chunks):
            if n_chunks == 1 and size == n_rows:
                # Whole-array copy: single descriptor, no slicing.
                cp = pltpu.make_async_copy(x_ref, o_ref, sems.at[i])
            else:
                cp = pltpu.make_async_copy(
                    x_ref.at[pl.ds(start, size)],
                    o_ref.at[pl.ds(start, size)],
                    sems.at[i],
                )
            copies.append(cp)
        # Start every DMA first (multiple outstanding transfers), then wait.
        for cp in copies:
            cp.start()
        for cp in copies:
            cp.wait()

    copy_call = pl.pallas_call(
        kernel,
        out_shape=jax.ShapeDtypeStruct(view_shape, dtype),
        in_specs=[pl.BlockSpec(memory_space=pl.ANY)],
        out_specs=pl.BlockSpec(memory_space=pl.ANY),
        scratch_shapes=[pltpu.SemaphoreType.DMA((n_chunks,))],
    )

    def clone(x):
        # Merging leading dims preserves the (8,128) tiled layout of the last
        # two dims, so this reshape is a free bitcast inside the jit (no
        # relayout / extra HBM traffic).
        y = copy_call(x.reshape(view_shape))
        return y.reshape(orig_shape)

    return jax.jit(clone)


def pallas_clone(x: jax.Array) -> jax.Array:
    """Independent copy of `x` (the `.detach().clone()` hot path) via a direct
    HBM->HBM DMA Pallas kernel (no VMEM staging, no grid)."""
    if x.size == 0:
        return x  # degenerate: nothing to copy

    orig_shape = tuple(x.shape)
    dtype = jnp.dtype(x.dtype)

    # Choose a >=2-D view whose leading axis we can chunk without touching the
    # layout of the last two dims.
    if x.ndim >= 3:
        lead = 1
        for d in orig_shape[:-2]:
            lead *= d
        view_shape = (lead,) + orig_shape[-2:]
        row_align = 1          # each leading index is a full 2-D slab (tile-aligned)
    elif x.ndim == 2:
        view_shape = orig_shape
        row_align = 8          # keep DMA row offsets sublane-aligned
    elif x.ndim == 1:
        view_shape = orig_shape
        row_align = 0          # don't chunk 1-D arrays
    else:  # 0-D scalar
        view_shape = (1, 1)
        row_align = 0

    total_bytes = x.size * dtype.itemsize
    n_rows = view_shape[0]
    if row_align == 0 or total_bytes < _MIN_BYTES_FOR_CHUNKING or n_rows < 2:
        chunks = ((0, n_rows),)
    else:
        target = min(_MAX_DMA_CHUNKS, n_rows)
        rows_per = -(-n_rows // target)                       # ceil divide
        rows_per = -(-rows_per // row_align) * row_align      # round up to alignment
        chunks = tuple(
            (s, min(rows_per, n_rows - s)) for s in range(0, n_rows, rows_per)
        )

    clone_fn = _build_dma_clone(orig_shape, view_shape, dtype.name, chunks)
    return clone_fn(x)


class TensorRecorder:
    """JAX/Pallas port of the PyTorch TensorRecorder.

    Attributes:
        record_mode: "first" | "last" | "all".
        _gen_data / _prefill_data: recorded copies (list / array / None).
    """

    def __init__(self, name: str, record_mode: Literal["first", "last", "all"] = "first"):
        self.name = name
        self.record_mode = record_mode
        self._clear("both")
        self._forward_methods = {
            "all": self._forward_all,
            "last": self._forward_last,
            "first": self._forward_first,
        }

    def _clear(self, clear_mode: Literal["gen", "prefill", "both"] = "both"):
        clear_value = lambda: list() if self.record_mode == "all" else None
        if clear_mode in ["gen", "both"]:
            self._gen_data = clear_value()
        if clear_mode in ["prefill", "both"]:
            self._prefill_data = clear_value()

    def _safe_get(self, some_data):
        # jax.Arrays are immutable, so the copy made in forward() is already an
        # independent clone; returning the stored reference preserves PyTorch's
        # `.clone()` semantics without a second HBM->HBM pass (halves
        # retrieval-path memory traffic vs re-cloning here).
        if isinstance(some_data, list):
            return list(some_data)
        if isinstance(some_data, jax.Array):
            return some_data
        if some_data is None:
            print(
                f"Warning: recorder data of layer {self.name} is empty, returning None."
                " (in TensorRecorder._safe_get)"
            )
            return None
        raise TypeError(
            f"Expected self._data to be of type list | jax.Array | None. "
            f"Got {type(some_data)} instead."
        )

    def get_clear(self, get_mode: Literal["gen", "prefill"]):
        assert get_mode in ["gen", "prefill"], "Invalid get_mode."
        if get_mode == "gen":
            return_data = self._safe_get(self._gen_data)
        else:
            return_data = self._safe_get(self._prefill_data)
        if isinstance(return_data, list):
            for tensor in return_data:
                assert isinstance(tensor, jax.Array), "Tensor not of type Array."
        else:
            assert isinstance(return_data, jax.Array) or return_data is None, (
                "Tensor not of type Array | None."
            )
        self._clear(clear_mode=get_mode)
        return return_data

    def __call__(self, x):
        return self.forward(x)

    def forward(self, x):
        # Route on the sequence axis exactly like the PyTorch module (rank >= 3).
        if x.shape[2] == 1:
            attr_name = "_gen_data"
        else:
            attr_name = "_prefill_data"
        self._forward_methods[self.record_mode](x, attr_name)
        # forward() returns None, matching the original module.

    # `.detach().cpu()` in PyTorch == make an independent copy off the autodiff
    # graph; the Pallas DMA clone provides that copy.  JAX dispatches it
    # asynchronously, so the host is never blocked by the recorder.
    # TODO(synk): host ("cpu") placement of the recorded copy (jax.device_put
    # to a CPU device) and a P10 cross-call semaphore future that defers the
    # wait to get_clear are runtime placement/scheduling concerns, not
    # expressible inside the TPU kernel; recorded copies stay in HBM here.
    def _forward_all(self, x, attr_name):
        self_data = getattr(self, attr_name)
        assert isinstance(self_data, list) and isinstance(x, jax.Array), (
            f"Need self._data to be `list` and x to be `jax.Array`, "
            f"but got {type(self_data)} and {type(x)}."
        )
        self_data.append(pallas_clone(x))

    def _forward_first(self, x, attr_name):
        if getattr(self, attr_name) is None:
            setattr(self, attr_name, pallas_clone(x))

    def _forward_last(self, x, attr_name):
        setattr(self, attr_name, pallas_clone(x))


if __name__ == "__main__":
    key = jax.random.PRNGKey(0)
    k1, k2, k3, k4, k5 = jax.random.split(key, 5)

    # Prefill-shaped input: [batch=2, heads=4, seq=8, head_dim=32] -> single DMA.
    x_prefill = jax.random.normal(k1, (2, 4, 8, 32), dtype=jnp.float32)
    # Gen-shaped input (seq == 1 routes to the "gen" slot) -> tiny single DMA.
    x_gen = jax.random.normal(k2, (2, 4, 1, 32), dtype=jnp.float32)
    # Large ragged case -> merged leading dim (16, 1023, 128), 4 chunked DMAs.
    x_large = jax.random.normal(k3, (2, 8, 1023, 128), dtype=jnp.float32)
    # Non-128-multiple last dim + bf16 (old masked-store fallback): DMA is layout-agnostic.
    x_odd = jax.random.normal(k4, (2, 4, 16, 96), dtype=jnp.bfloat16)
    # Rank-2 chunked case (row offsets kept sublane-aligned).
    x_2d = jax.random.normal(k5, (4096, 256), dtype=jnp.float32)

    rec = TensorRecorder(name="attn_probe", record_mode="first")
    rec(x_prefill)
    rec(x_gen)

    prefill_copy = rec.get_clear("prefill")
    gen_copy = rec.get_clear("gen")
    large_copy = pallas_clone(x_large)
    odd_copy = pallas_clone(x_odd)
    copy_2d = pallas_clone(x_2d)

    for src, dst in [
        (x_prefill, prefill_copy),
        (x_gen, gen_copy),
        (x_large, large_copy),
        (x_odd, odd_copy),
        (x_2d, copy_2d),
    ]:
        jax.block_until_ready(dst)
        assert dst.shape == src.shape and dst.dtype == src.dtype
        assert bool(jnp.all(dst == src))

    # After get_clear, slots must be empty (record_mode="first" -> None).
    assert rec._prefill_data is None and rec._gen_data is None

    # "all" mode bookkeeping + cached-build reuse (same shape recorded twice).
    rec_all = TensorRecorder(name="attn_probe_all", record_mode="all")
    rec_all(x_prefill)
    rec_all(x_prefill)
    got = rec_all.get_clear("prefill")
    assert isinstance(got, list) and len(got) == 2
    for t in got:
        jax.block_until_ready(t)
        assert bool(jnp.all(t == x_prefill))
    assert rec_all._prefill_data == []

    # "last" mode.
    rec_last = TensorRecorder(name="attn_probe_last", record_mode="last")
    rec_last(x_gen)
    rec_last(x_gen)
    last = rec_last.get_clear("gen")
    jax.block_until_ready(last)
    assert bool(jnp.all(last == x_gen))

    print("KERNEL_OK")
</pallas_src>

<mosaic_0001>
module attributes {stable_mosaic.version = 11 : i64} {
  func.func @kernel(%arg0: memref<8x8x32xf32, #tpu.memory_space<any>>, %arg1: memref<8x8x32xf32, #tpu.memory_space<any>>, %arg2: memref<1x!tpu.dma_semaphore, #tpu.memory_space<semaphore_mem>>) attributes {dimension_semantics = [], scalar_prefetch = 0 : i64, scratch_operands = 1 : i64, tpu.core_type = #tpu.core_type<tc>} {
    %c0_i32 = arith.constant 0 : i32
    %0 = tpu.memref_slice %arg2[%c0_i32] : memref<1x!tpu.dma_semaphore, #tpu.memory_space<semaphore_mem>> -> memref<1x!tpu.dma_semaphore, #tpu.memory_space<semaphore_mem>>
    %1 = tpu.memref_squeeze %0 : memref<1x!tpu.dma_semaphore, #tpu.memory_space<semaphore_mem>> -> memref<!tpu.dma_semaphore, #tpu.memory_space<semaphore_mem>>
    tpu.enqueue_dma source(%arg0 : memref<8x8x32xf32, #tpu.memory_space<any>>) target(%arg1 : memref<8x8x32xf32, #tpu.memory_space<any>>) target_semaphore(%1 : memref<!tpu.dma_semaphore, #tpu.memory_space<semaphore_mem>>)
    %c0_i32_0 = arith.constant 0 : i32
    %2 = tpu.memref_slice %arg2[%c0_i32_0] : memref<1x!tpu.dma_semaphore, #tpu.memory_space<semaphore_mem>> -> memref<1x!tpu.dma_semaphore, #tpu.memory_space<semaphore_mem>>
    %3 = tpu.memref_squeeze %2 : memref<1x!tpu.dma_semaphore, #tpu.memory_space<semaphore_mem>> -> memref<!tpu.dma_semaphore, #tpu.memory_space<semaphore_mem>>
    tpu.wait_dma2 semaphore(%3 : memref<!tpu.dma_semaphore, #tpu.memory_space<semaphore_mem>>) src(%arg0 : memref<8x8x32xf32, #tpu.memory_space<any>>) dst(%arg1 : memref<8x8x32xf32, #tpu.memory_space<any>>)
    return
  }
}

</mosaic_0001>

<bundles_post_ra>
// kernel: clone.1
= control target key start
LH: loop header
LB: loop body
LE: loop exit
PB: predicated region body
PF: predicated region fallthrough
CT: control target
= control target key end

     0   :  { %s29_s6 = smov [#allocation2]   ;;  %s30_s7 = smov 131072   ;;  %s48_s0 = inlined_call_operand.hbm [shape: f32[8,8,32], index: 0, kind: input, shape index: {}]   ;;  %s49_s1 = inlined_call_operand.hbm [shape: f32[8,8,32], index: 1, kind: output, shape index: {}]  }
   0x1   :  { %s31_s8 = smov 0  }
   0x2   :  { %12 = dma.general %s48_s0, 1024, %s49_s1, %s29_s6, %s30_s7, [#allocation4], %s31_s8, 0  }
   0x3   :  { %27 = dma.done.wait [#allocation2], 1024 }
   0x4   :  { %28 = vsyncadd [#allocation2], 4294966272 }
   0x5   :  { %17 = vsyncmov [#allocation2] }
   0x8   :  { %s18_s13 = vpop.sfrf %17 }
   0x9   :  { %p23_p0 = scmp.ne.s32.totalorder %s18_s13, 0 }
   0xb   :  { %22 = shalt.err (%p23_p0)  }

</bundles_post_ra>
